<compile_context>
chip_gen: v6e
topology: v6e:2x2x1
jax: 0.10.0
libtpu: 0.0.40
codegen_flags: <defaults>
</compile_context>

<pallas_src>
import functools

import numpy as np

import jax
import jax.numpy as jnp
from jax.experimental import pallas as pl
from jax.experimental.pallas import tpu as pltpu

_LANES = 128
_MAX_TILE_ROWS = 1024  # 1024 x 128 x 4B = 512 KiB per f32 block (x2 buffers)


def _sublane_align(dtype):
    """Native sublane packing: f32 -> 8, bf16 -> 16, int8/fp8 -> 32."""
    itemsize = jnp.dtype(dtype).itemsize
    if itemsize >= 4:
        return 8
    return 8 * (4 // itemsize)


def _round_up(x, m):
    return ((x + m - 1) // m) * m


def _accumulate(acc_ref, tile_f32):
    """Fold a (tile_r, 128) f32 tile into the resident (8, 128) accumulator."""
    r = tile_f32.shape[0]
    if r == 8:
        acc_ref[...] += tile_f32
    else:
        acc_ref[...] += tile_f32.reshape(r // 8, 8, _LANES).sum(axis=0)


def _bce_sum_kernel(is_real, x_ref, acc_ref):
    """Sum of stable BCE-with-logits loss vs. a constant 0/1 target.

    is_real : Python bool baked at trace time (no SMEM scalar operand).
    x_ref   : (tile_r, 128) input tile (any float dtype; upcast here).
    acc_ref : (8, 128) f32 output block, resident across grid axis 1.
    """
    @pl.when(pl.program_id(1) == 0)
    def _init():
        acc_ref[...] = jnp.zeros_like(acc_ref)

    x = x_ref[...].astype(jnp.float32)
    z = -x if is_real else x
    loss = jnp.maximum(z, 0.0) + jnp.log1p(jnp.exp(-jnp.abs(x)))
    _accumulate(acc_ref, loss)


def _sum_kernel(x_ref, acc_ref):
    """Plain sum (for the non-bce +/- mean path)."""
    @pl.when(pl.program_id(1) == 0)
    def _init():
        acc_ref[...] = jnp.zeros_like(acc_ref)

    _accumulate(acc_ref, x_ref[...].astype(jnp.float32))


def _tiled_partial_sums(kernel, x):
    """Stream x through `kernel`, returning ((ncores*8,128) partials, n, pad)."""
    n = int(x.size)
    align = _sublane_align(x.dtype)

    rows0 = pl.cdiv(n, _LANES)
    # 2-way core split: helps v7x's 2 TensorCores, harmless elsewhere.
    ncores = 2 if rows0 >= 2 * align else 1
    tile_r = min(_MAX_TILE_ROWS, _round_up(pl.cdiv(rows0, ncores), align))
    padded_rows = _round_up(rows0, ncores * tile_r)
    steps = padded_rows // (ncores * tile_r)
    pad_count = padded_rows * _LANES - n

    flat = jnp.pad(jnp.ravel(x), (0, pad_count))
    x2d = flat.reshape(padded_rows, _LANES)

    partials = pl.pallas_call(
        kernel,
        out_shape=jax.ShapeDtypeStruct((ncores * 8, _LANES), jnp.float32),
        grid_spec=pltpu.PrefetchScalarGridSpec(
            num_scalar_prefetch=0,
            grid=(ncores, steps),
            in_specs=[
                pl.BlockSpec((tile_r, _LANES),
                             lambda c, i: (c * steps + i, 0)),
            ],
            out_specs=pl.BlockSpec((8, _LANES), lambda c, i: (c, 0)),
        ),
        compiler_params=pltpu.CompilerParams(
            dimension_semantics=("parallel", "arbitrary")),
    )(x2d)
    return partials, n, pad_count


class AdversarialLoss:
    """JAX/Pallas port of Denoising/losses.py::AdversarialLoss."""

    def __init__(self, use_logits=True, gan_type="bce"):
        if gan_type == "bce" and not use_logits:
            # TODO(synk): plain BCELoss (probability inputs) path not ported.
            raise NotImplementedError("use_logits=False not supported")
        self.gan_type = gan_type
        self.use_logits = use_logits

    def __call__(self, disc_pred, is_real):
        # NOTE: is_real must be a Python bool (resolved at trace time).
        if self.gan_type == "bce":
            kernel = functools.partial(_bce_sum_kernel, bool(is_real))
            partials, n, pad = _tiled_partial_sums(kernel, disc_pred)
            total = jnp.sum(partials)
            # Each zero-padded element contributed exactly softplus(0) = ln(2).
            if pad:
                total = total - jnp.float32(pad) * jnp.float32(np.log(2.0))
            return total / jnp.float32(n)
        else:
            partials, n, _ = _tiled_partial_sums(_sum_kernel, disc_pred)
            total = jnp.sum(partials)  # zero padding contributes 0 here
            sign = -1.0 if is_real else 1.0
            return jnp.float32(sign) * total / jnp.float32(n)


def _reference_bce_with_logits(x, target_value):
    x = x.astype(jnp.float32)
    t = jnp.full_like(x, target_value)
    loss = jnp.maximum(x, 0.0) - x * t + jnp.log1p(jnp.exp(-jnp.abs(x)))
    return jnp.mean(loss)


if __name__ == "__main__":
    key = jax.random.PRNGKey(0)
    # Discriminator output, NCHW (small shapes for the self-test).
    disc_pred = jax.random.normal(key, (2, 4, 16, 16), dtype=jnp.float32)

    adv = AdversarialLoss(use_logits=True, gan_type="bce")

    loss_real = jax.block_until_ready(adv(disc_pred, True))
    loss_fake = jax.block_until_ready(adv(disc_pred, False))

    ref_real = _reference_bce_with_logits(disc_pred, 1.0)
    ref_fake = _reference_bce_with_logits(disc_pred, 0.0)

    assert jnp.allclose(loss_real, ref_real, atol=1e-5, rtol=1e-5), (
        loss_real, ref_real)
    assert jnp.allclose(loss_fake, ref_fake, atol=1e-5, rtol=1e-5), (
        loss_fake, ref_fake)

    # Non-bce ("wgan"-style mean) path.
    adv_mean = AdversarialLoss(use_logits=True, gan_type="wgan")
    m_real = jax.block_until_ready(adv_mean(disc_pred, True))
    m_fake = jax.block_until_ready(adv_mean(disc_pred, False))
    assert jnp.allclose(m_real, -jnp.mean(disc_pred), atol=1e-5, rtol=1e-5)
    assert jnp.allclose(m_fake, jnp.mean(disc_pred), atol=1e-5, rtol=1e-5)

    # bf16 input path: no wrapper-side cast, kernel upcasts per tile.
    disc_bf16 = disc_pred.astype(jnp.bfloat16)
    loss_bf16 = jax.block_until_ready(adv(disc_bf16, True))
    ref_bf16 = _reference_bce_with_logits(disc_bf16, 1.0)
    assert jnp.allclose(loss_bf16, ref_bf16, atol=1e-2, rtol=1e-2), (
        loss_bf16, ref_bf16)

    print("KERNEL_OK")
</pallas_src>

<mosaic_0001>
module attributes {stable_mosaic.version = 11 : i64} {
  func.func @_bce_sum_kernel(%arg0: i32, %arg1: i32, %arg2: memref<8x128xf32, #tpu.memory_space<vmem>>, %arg3: memref<8x128xf32, #tpu.memory_space<vmem>>) attributes {dimension_semantics = [#tpu.dimension_semantics<parallel>, #tpu.dimension_semantics<arbitrary>], iteration_bounds = array<i64: 2, 1>, scalar_prefetch = 0 : i64, scratch_operands = 0 : i64, tpu.core_type = #tpu.core_type<tc>, window_params = [{transform_indices = @transform_0, window_bounds = array<i64: 8, 128>}, {transform_indices = @transform_1, window_bounds = array<i64: 8, 128>}]} {
    %c0_i32 = arith.constant 0 : i32
    %0 = arith.cmpi eq, %arg1, %c0_i32 : i32
    %1 = arith.extui %0 : i1 to i32
    %c0_i32_0 = arith.constant 0 : i32
    %2 = arith.cmpi ne, %1, %c0_i32_0 : i32
    scf.if %2 {
      %cst_8 = arith.constant 0.000000e+00 : f32
      %17 = vector.broadcast %cst_8 : f32 to vector<8x128xf32>
      %c0_9 = arith.constant 0 : index
      %c0_10 = arith.constant 0 : index
      %18 = vector.load %arg3[%c0_9, %c0_10] : memref<8x128xf32, #tpu.memory_space<vmem>>, vector<8x128xf32>
      tpu.vector_store %arg3[%c0_9, %c0_10], %17 {strides = array<i32>} : memref<8x128xf32, #tpu.memory_space<vmem>>, vector<8x128xf32>,
    } else {
    }
    %c0 = arith.constant 0 : index
    %c0_1 = arith.constant 0 : index
    %3 = vector.load %arg2[%c0, %c0_1] : memref<8x128xf32, #tpu.memory_space<vmem>>, vector<8x128xf32>
    %cst = arith.constant 0.000000e+00 : f32
    %4 = vector.broadcast %cst : f32 to vector<8x128xf32>
    %5 = arith.subf %4, %3 : vector<8x128xf32>
    %cst_2 = arith.constant 0.000000e+00 : f32
    %6 = vector.broadcast %cst_2 : f32 to vector<8x128xf32>
    %7 = arith.maximumf %5, %6 : vector<8x128xf32>
    %8 = math.absf %3 : vector<8x128xf32>
    %cst_3 = arith.constant 0.000000e+00 : f32
    %9 = vector.broadcast %cst_3 : f32 to vector<8x128xf32>
    %10 = arith.subf %9, %8 : vector<8x128xf32>
    %11 = math.exp %10 : vector<8x128xf32>
    %12 = math.log1p %11 : vector<8x128xf32>
    %13 = arith.addf %7, %12 : vector<8x128xf32>
    %c0_4 = arith.constant 0 : index
    %c0_5 = arith.constant 0 : index
    %14 = vector.load %arg3[%c0_4, %c0_5] : memref<8x128xf32, #tpu.memory_space<vmem>>, vector<8x128xf32>
    %15 = arith.addf %14, %13 : vector<8x128xf32>
    %c0_6 = arith.constant 0 : index
    %c0_7 = arith.constant 0 : index
    %16 = vector.load %arg3[%c0_6, %c0_7] : memref<8x128xf32, #tpu.memory_space<vmem>>, vector<8x128xf32>
    tpu.vector_store %arg3[%c0_6, %c0_7], %15 {strides = array<i32>} : memref<8x128xf32, #tpu.memory_space<vmem>>, vector<8x128xf32>,
    return
  }
  func.func @transform_0(%arg0: i32, %arg1: i32) -> (i32, i32) {
    %c1_i32 = arith.constant 1 : i32
    %0 = arith.muli %arg0, %c1_i32 : i32
    %1 = arith.addi %0, %arg1 : i32
    %c0_i32 = arith.constant 0 : i32
    %c0_i32_0 = arith.constant 0 : i32
    return %1, %c0_i32 : i32, i32
  }
  func.func @transform_1(%arg0: i32, %arg1: i32) -> (i32, i32) {
    %c0_i32 = arith.constant 0 : i32
    %c0_i32_0 = arith.constant 0 : i32
    return %arg0, %c0_i32 : i32, i32
  }
}

</mosaic_0001>

<bundles_post_ra>
// kernel: tpu_custom_call.1
= control target key start
LH: loop header
LB: loop body
LE: loop exit
PB: predicated region body
PF: predicated region fallthrough
CT: control target
= control target key end

     0   :  { %6 = vsyncpa [#allocation3], 0  ;;  %s602_s0 = inlined_call_operand.hbm [shape: f32[16,128], index: 0, kind: input, shape index: {}]   ;;  %s603_s1 = inlined_call_operand.hbm [shape: f32[16,128], index: 1, kind: output, shape index: {}]  }
   0x1   :  { %8 = vsyncpa [#allocation3 + $0x1], 0 }
   0x2   :  { %9 = vsyncpa [#allocation4], 0 }
   0x3   :  { %11 = vsyncpa [#allocation4 + $0x1], 0  ;;  %s468_s6 = smov 0   ;;  %s470_s7 = smov 0  }
   0x4   :  { %s472_s8 = smov 0   ;;  %s474_s9 = smov 0  }
   0x5   :  { %s476_s10 = smov 0   ;;  %s478_s11 = smov 0  }
   0x6 LB: > { %s266_s12 = sadd.s32 4294967295, %s454_s11   ;;  %s267_s13 = sadd.s32 4294967294, %s454_s11   ;;  %s454_s11 = sphi %s478_s11, %s17_s11   ;;  %s450_s10 = sphi %s476_s10, %s615_s10   ;;  %s446_s9 = sphi %s474_s9, %s614_s9   ;;  %s442_s8 = sphi %s472_s8, %s613_s8   ;;  %s438_s7 = sphi %s470_s7, %s612_s7   ;;  %s434_s6 = sphi %s468_s6, %s611_s6  }
   0x7   : > { %s29_s14 = sadd.s32 1, %s450_s10  ;;  %s38_s15 = sadd.s32 1, %s442_s8 }
   0x8   : > { %p31_p0 = scmp.ge.s32.totalorder %s29_s14, 2  ;;  %p45_p1 = scmp.ne.s32.totalorder %s442_s8, %s438_s7 }
   0x9   : > { %p46_p2 = scmp.eq.s32.totalorder %s454_s11, 0  ;;  %p51_p3 = scmp.ne.s32.totalorder %s438_s7, %s434_s6 }
   0xa   : > { %s617_s14 = smov (%p31_p0, %s29_s14), 0  ;;  %p52_p5 = scmp.eq.s32.totalorder %s266_s12, 0 }
   0xb   : > { %p509_p4 = por %p46_p2, %p45_p1  ;;  %s35_s17 = ssub.s32 %s450_s10, %s617_s14 }
   0xc   : > { %p75_p6 = scmp.eq.s32.totalorder %s266_s12, 1  ;;  %p36_p7 = scmp.eq.s32.totalorder %s35_s17, 0 }
   0xd   : > { %p515_p8 = por %p52_p5, %p51_p3  ;;  %p81_p10 = scmp.eq.s32.totalorder %s267_s13, 1 }
   0xe   : > { %p519_p9 = por %p75_p6, %p45_p1  ;;  %p291_p13 = scmp.lt.s32.totalorder %s454_s11, 2 }
   0xf   : > { %s524_s20 = scalar_select %p36_p7, %s442_s8, %s38_s15  }
  0x10   : > { %p526_p11 = por %p81_p10, %p51_p3  ;;  %s101_s22 = sand.u32 1, %s442_s8  }
  0x11   : > { %s270_s23 = sshll.u32 %s101_s22, 3  ;;  %s271_s24 = sshll.u32 %s450_s10, 7 }
  0x12   : > { %s607_s21 = scalar_select %p526_p11, 1, 0 }
  0x13   : > { %s111_s27 = scalar_lea.hbm %s602_s0, %s271_s24  ;;  %s105_s28 = scalar_lea.vmem [#allocation2], %s270_s23 }
  0x14   : > { %s113_s29 = sshll.u32 %s105_s28, 4  ;;  %p539_p0 = pnand %p291_p13, %p509_p4  ;;  %s114_s29 = int_to_ptr.vmem [resolvable:$true] %s113_s29 }
  0x15   : > { %p272_p1 = scmp.ge.s32.totalorder %s454_s11, 1  ;;  %p118_p2 = scmp.lt.s32.totalorder %s454_s11, 3 }
  0x16   : > { %s102_s2 = scalar_lea.sflag [#allocation3], %s101_s22  ;;  %p348_p3 = pneg %p539_p0 }
  0x17   : > { %s359_s3 = scalar_lea.vmem %s114_s29, 128  ;;  %s456_s4 = smov [#allocation2]  }
  0x18   : > { %p360_p5 = scmp.ne.s32.totalorder %s114_s29, %s359_s3  ;;  %s364_s5 = sshll.u32 %s456_s4, 4  ;;  %s365_s5 = int_to_ptr.vmem [resolvable:$false] %s364_s5 }
  0x19   : > { %s366_s12 = scalar_lea.vmem %s365_s5, 256  ;;  %p367_p10 = scmp.lt.s32.totalorder %s114_s29, %s365_s5 }
  0x1a   : > { %p362_p6 = pnand %p360_p5, %p348_p3  ;;  %p368_p12 = scmp.lt.s32.totalorder %s366_s12, %s359_s3 }
  0x1c   : > { %p363_p7 = pneg %p362_p6  ;;  %p369_p4 = por %p368_p12, %p367_p10 }
  0x1e   : > { %p370_p13 = pnand %p369_p4, %p363_p7 }
  0x20   : > { %373 = shalt.err (!%p370_p13)
}
  0x21   : > { %286 = dma.hbm_to_vmem [thread:$0]  (!%p539_p0), %s111_s27, 128, %s114_s29, %s102_s2  }
  0x22   : > { %p119_p11 = pnand %p272_p1, %p118_p2 }
  0x23   : > { %s554_s13 = sand.u32 (!%p119_p11), 1, %s438_s7  }
  0x24   : > { %122 = sbr.rel (%p119_p11) target bundleno = 97 (0x61), region = 24  ;;  %s273_s15 = sshll.u32 (!%p119_p11), %s554_s13, 3 }
  0x25   : > { %s125_s16 = scalar_lea.sflag (!%p119_p11), [#allocation3], %s554_s13  ;;  %s128_s17 = scalar_lea.vmem (!%p119_p11), [#allocation2], %s273_s15 }
  0x29   : > { %425 = dma.done.wait (%p515_p8), %s125_s16, 128  }
  0x2a   : > { %427 = vsyncadd (%p515_p8), %s125_s16, 4294967168  ;;  %v153_v0 = vld [vmem:[%s128_s17] sm:$0xff]  ;;  %s276_s18 = sshll.u32 %s446_s9, 7  ;;  %s146_s22 = scalar_lea.vmem [#allocation5], %s273_s15 }
  0x2b   : > { %v156_v1 = vand.u32 2147483647, %v153_v0  ;;  %v154_v8 = vsub.f32 0.0, %v153_v0  ;;  %s187_s23 = sshll.u32 %s146_s22, 4  ;;  %s185_s26 = scalar_lea.hbm %s603_s1, %s276_s18  ;;  %s188_s23 = int_to_ptr.vmem [resolvable:$true] %s187_s23 }
  0x2c   : > { %s174_s27 = scalar_lea.sflag [#allocation4], %s554_s13  ;;  %s374_s28 = scalar_lea.vmem %s188_s23, 128 }
  0x2d   : > { %v157_v2 = vsub.f32 0.0, %v156_v1  ;;  %v155_v12 = vmax.f32 %v154_v8, 0.0  ;;  %p375_p8 = scmp.ne.s32.totalorder %s188_s23, %s374_s28  ;;  %s457_s29 = smov [#allocation5]  }
  0x2e   : > { %s378_s30 = sshll.u32 %s457_s29, 4  ;;  %s379_s30 = int_to_ptr.vmem [resolvable:$false] %s378_s30 }
  0x2f   : > { %v158_v3 = vmul.f32 1.442695, %v157_v2  ;;  %p376_p11 = pnand %p375_p8, %p519_p9  ;;  %s380_s2 = scalar_lea.vmem %s379_s30, 256 }
  0x30   : > { %p381_p0 = scmp.lt.s32.totalorder %s188_s23, %s379_s30  ;;  %p382_p1 = scmp.lt.s32.totalorder %s380_s2, %s374_s28 }
  0x31   : > { %342 = vpow2.f32 %v158_v3  ;;  %p377_p12 = pneg %p376_p11 }
  0x32   : > { %p383_p2 = por %p382_p1, %p381_p0 }
  0x34   : > { %p384_p3 = pnand %p383_p2, %p377_p12 }
  0x3e   : > { %v343_v4 = vpop.eup %342 }
  0x3f   : > { %v160_v5 = vadd.f32 1.0, %v343_v4  ;;  %v163_v6 = vmul.f32 -0.5, %v343_v4  ;;  %v166_v9 = vand.u32 2147483647, %v343_v4 }
  0x41   : > { %344 = vlog2.f32 %v160_v5  ;;  %v164_v7 = vadd.f32 1.0, %v163_v6  ;;  %vm167_vm0 = vcmp.lt.f32.partialorder %v166_v9, 0.0004427343 }
  0x43   : > { %v165_v10 = vmul.f32 %v343_v4, %v164_v7 }
  0x4e   : > { %v345_v11 = vpop.eup %344 }
  0x4f   : > { %v162_v13 = vmul.f32 0.6931472, %v345_v11 }
  0x51   : > { %v168_v14 = vsel %vm167_vm0, %v165_v10, %v162_v13 }
  0x52   : > { %v169_v15 = vadd.f32 %v168_v14, %v155_v12 }
  0x54   : > { %172 = vst [vmem:[%s146_s22] sm:$0xff] %v169_v15 }
  0x55   : > { %387 = shalt.err (!%p384_p3)
}
  0x56   : > { %s388_s9 = scalar_lea.hbm %s185_s26, 128  ;;  %s392_s5 = scalar_lea.hbm %s603_s1, 256 }
  0x57   : > { %p389_p5 = scmp.ne.s32.totalorder %s185_s26, %s388_s9  ;;  %p393_p10 = scmp.lt.s32.totalorder %s185_s26, %s603_s1 }
  0x58   : > { %p394_p4 = scmp.lt.s32.totalorder %s392_s5, %s388_s9 }
  0x59   : > { %p390_p6 = pnand %p389_p5, %p519_p9 }
  0x5a   : > { %p395_p13 = por %p394_p4, %p393_p10 }
  0x5b   : > { %p391_p7 = pneg %p390_p6 }
  0x5d   : > { %p396_p8 = pnand %p395_p13, %p391_p7 }
  0x5f   : > { %399 = shalt.err (!%p396_p8)
}
  0x60   : > { %281 = dma.vmem_to_hbm [thread:$0]  (%p519_p9), %s188_s23, 128, %s185_s26, %s174_s27  }
  0x61 PF: > { %s199_s15 = sand.u32 1, %s434_s6   ;;  %p609_p11 = scmp.ne.s32.totalorder %s607_s21, 0 }
  0x62   : > { %p610_p12 = scmp.ge.s32.totalorder %s454_s11, 2  ;;  %s200_s16 = scalar_lea.sflag [#allocation4], %s199_s15 }
  0x64   : > { %p288_p0 = pnand %p610_p12, %p609_p11 }
  0x66   : > { %p289_p1 = pneg %p288_p0 }
  0x68   : > { %429 = dma.done.wait (%p289_p1), %s200_s16, 128  }
  0x69   : > { %431 = vsyncadd (%p289_p1), %s200_s16, 4294967168  ;;  %s17_s11 = sadd.s32 1, %s454_s11   ;;  %s611_s6 = smov %s438_s7 }
  0x6a   : > { %p14_p2 = scmp.ge.s32.totalorder %s17_s11, 4   ;;  %s612_s7 = smov %s442_s8 }
  0x6b   : > { %s613_s8 = smov %s524_s20  ;;  %s614_s9 = smov %s450_s10 }
  0x6c   : > { %s615_s10 = smov %s617_s14  ;;  %16 = sbr.rel (!%p14_p2) target bundleno = 6 (0x6), region = 73 }
  0x71   :  { %205 = vsyncpa [#allocation3], 1 }
  0x72   :  { %207 = vsyncpa [#allocation3 + $0x1], 1 }
  0x73   :  { %208 = vsyncpa [#allocation4], 1 }
  0x74   :  { %210 = vsyncpa [#allocation4 + $0x1], 1 }

</bundles_post_ra>
